<compile_context>
chip_gen: v6e
topology: v6e:2x2x1
jax: 0.10.0
libtpu: 0.0.40
codegen_flags: <defaults>
</compile_context>

<pallas_src>
import functools
import math

import jax
import jax.numpy as jnp
from jax import lax
from jax.experimental import pallas as pl
from jax.experimental.pallas import tpu as pltpu


# ---------------------------------------------------------------------------
# In-kernel helpers
# ---------------------------------------------------------------------------
def _layer_norm(x, gamma, beta, eps):
    """LayerNorm over the last dim, computed in f32.  x: (T, E); gamma/beta: (1, E)."""
    xf = x.astype(jnp.float32)
    mu = jnp.mean(xf, axis=-1, keepdims=True)
    var = jnp.mean(jnp.square(xf - mu), axis=-1, keepdims=True)
    inv = lax.rsqrt(var + eps)
    return (xf - mu) * inv * gamma + beta


# ---------------------------------------------------------------------------
# Kernel 1: LN1 + fused QKV projection (softmax scale pre-folded into Q weight)
# ---------------------------------------------------------------------------
def _ln1_qkv_kernel(x_ref, g1_ref, b1_ref, wqkv_ref, bqkv_ref,
                    q_ref, k_ref, v_ref, *, eps, embed_dim):
    x = x_ref[0]                                             # (tq, E)
    h = _layer_norm(x, g1_ref[...], b1_ref[...], eps)        # f32 (tq, E)
    h = h.astype(wqkv_ref.dtype)                             # bf16 (or f32) operand

    qkv = jnp.dot(h, wqkv_ref[...],
                  preferred_element_type=jnp.float32) + bqkv_ref[...]   # (tq, 3E) f32

    E = embed_dim
    q_ref[0] = qkv[:, :E].astype(q_ref.dtype)        # Q already carries 1/sqrt(hd)
    k_ref[0] = qkv[:, E:2 * E].astype(k_ref.dtype)
    v_ref[0] = qkv[:, 2 * E:].astype(v_ref.dtype)


# ---------------------------------------------------------------------------
# Kernel 2 (fused): attention + out-proj + residual + LN2 + MLP + residual
# ---------------------------------------------------------------------------
def _attn_mlp_kernel(x_ref, q_ref, k_ref, v_ref, wo_ref, bo_ref,
                     g2_ref, b2_ref, w1_ref, bb1_ref, w2_ref, bb2_ref,
                     o_ref, *, num_heads, head_dim, eps, valid_len):
    tq = q_ref.shape[1]
    S = k_ref.shape[1]           # padded sequence length
    H, hd = num_heads, head_dim

    # Head-batched layout: (H, tile, hd) — no per-head lane slicing.
    q = q_ref[0].reshape(tq, H, hd).transpose(1, 0, 2)       # (H, tq, hd)
    k = k_ref[0].reshape(S, H, hd).transpose(1, 0, 2)        # (H, S,  hd)
    v = v_ref[0].reshape(S, H, hd).transpose(1, 0, 2)        # (H, S,  hd)

    # Scores (Q already scaled at the wrapper); softmax stats in f32.
    s = jnp.einsum("hqd,hkd->hqk", q, k,
                   preferred_element_type=jnp.float32)        # (H, tq, S)
    if S > valid_len:             # static: mask padded key positions
        key_idx = lax.broadcasted_iota(jnp.int32, (1, 1, S), 2)
        s = jnp.where(key_idx < valid_len, s, -1e30)

    m = jnp.max(s, axis=-1, keepdims=True)
    e = jnp.exp(s - m)                                        # (H, tq, S) f32
    l = jnp.sum(e, axis=-1, keepdims=True)                    # (H, tq, 1) f32

    # Un-normalized PV matmul, then scale by 1/l on the small (tq,H,hd) tensor.
    ctx = jnp.einsum("hqk,hkd->qhd", e.astype(v.dtype), v,
                     preferred_element_type=jnp.float32)      # (tq, H, hd) f32
    inv_l = pl.reciprocal(l, approx=True)                     # EUP, ~free
    ctx = ctx * jnp.transpose(inv_l, (1, 0, 2))               # (tq, H, 1) bcast
    ctx = ctx.reshape(tq, H * hd).astype(wo_ref.dtype)        # (tq, E)

    attn_out = jnp.dot(ctx, wo_ref[...],
                       preferred_element_type=jnp.float32) + bo_ref[...]
    h1 = x_ref[0].astype(jnp.float32) + attn_out              # residual 1 (f32)

    # LN2 + MLP (tanh GELU) + residual 2, all on the same resident tile.
    z = _layer_norm(h1, g2_ref[...], b2_ref[...], eps).astype(w1_ref.dtype)
    u = jnp.dot(z, w1_ref[...],
                preferred_element_type=jnp.float32) + bb1_ref[...]       # (tq, I)
    c = 0.7978845608028654  # sqrt(2/pi)
    g = 0.5 * u * (1.0 + jnp.tanh(c * (u + 0.044715 * u * u * u)))
    g = g.astype(w2_ref.dtype)
    y = jnp.dot(g, w2_ref[...],
                preferred_element_type=jnp.float32) + bb2_ref[...]       # (tq, E)

    o_ref[0] = (h1 + y).astype(o_ref.dtype)


# ---------------------------------------------------------------------------
# Wrapper helpers
# ---------------------------------------------------------------------------
def _round_up(a, b):
    return -(-a // b) * b


def _default_vmem_limit():
    # Leave ~1/8 headroom for Mosaic internal scratch: ~56 MiB on v7x (64 MiB
    # physical), ~112 MiB on v5e/v6e (128 MiB physical).
    try:
        cap = pltpu.get_tpu_info().vmem_capacity_bytes
        return int(cap * 7 // 8)
    except Exception:
        return 64 * 1024 * 1024


def _forward(hidden_states, params, *, num_heads, eps, qkv_seq_block,
             attn_seq_block, compute_dtype, vmem_limit_bytes,
             single_buffer_weights):
    B, S, E = hidden_states.shape
    H = num_heads
    hd = E // H
    scale = hd ** (-0.5)
    I = params["fc1_w"].shape[0]
    cdt = hidden_states.dtype if compute_dtype is None else compute_dtype

    # --- aligned tile sizes + padded sequence length -------------------------
    s8 = _round_up(S, 8)
    tq_qkv = max(8, min(_round_up(qkv_seq_block, 8), s8))
    tq_attn = max(8, min(_round_up(attn_seq_block, 8), s8))
    tile_lcm = tq_qkv * tq_attn // math.gcd(tq_qkv, tq_attn)
    S_pad = _round_up(S, tile_lcm)

    x_in = hidden_states
    if S_pad != S:
        x_in = jnp.pad(hidden_states, ((0, 0), (0, S_pad - S), (0, 0)))

    if vmem_limit_bytes is None:
        vmem_limit_bytes = _default_vmem_limit()

    # --- weight preparation (runs once, wrapper side) -------------------------
    # PyTorch Linear is y = x @ W.T + b -> pre-transpose to (in, out).
    # Fuse q|k|v into one (E, 3E) matmul and fold the softmax scale into Q.
    w_qkv = jnp.concatenate(
        [params["q_w"].T * scale, params["k_w"].T, params["v_w"].T], axis=1
    ).astype(cdt)                                                   # (E, 3E)
    b_qkv = jnp.concatenate(
        [params["q_b"] * scale, params["k_b"], params["v_b"]]
    )[None, :].astype(jnp.float32)                                  # (1, 3E)
    wo = params["o_w"].T.astype(cdt)                                # (E, E)
    bo = params["o_b"][None, :].astype(jnp.float32)                 # (1, E)
    w1 = params["fc1_w"].T.astype(cdt)                              # (E, I)
    bb1 = params["fc1_b"][None, :].astype(jnp.float32)              # (1, I)
    w2 = params["fc2_w"].T.astype(cdt)                              # (I, E)
    bb2 = params["fc2_b"][None, :].astype(jnp.float32)              # (1, E)
    g1 = params["ln1_g"][None, :].astype(jnp.float32)
    b1 = params["ln1_b"][None, :].astype(jnp.float32)
    g2 = params["ln2_g"][None, :].astype(jnp.float32)
    b2 = params["ln2_b"][None, :].astype(jnp.float32)

    cparams = pltpu.CompilerParams(
        dimension_semantics=("parallel", "parallel"),
        vmem_limit_bytes=vmem_limit_bytes,
    )

    # Constant-index weight spec: fetched once, kept resident; single-buffered
    # when the jax version supports pipeline_mode=pl.Buffered(1).
    def wspec(shape):
        idx = lambda *_: (0,) * len(shape)
        if single_buffer_weights and hasattr(pl, "Buffered"):
            try:
                return pl.BlockSpec(shape, idx, pipeline_mode=pl.Buffered(1))
            except (TypeError, AttributeError):
                pass
        return pl.BlockSpec(shape, idx)

    seq_spec_qkv = pl.BlockSpec((1, tq_qkv, E), lambda b, i: (b, i, 0))
    seq_spec_attn = pl.BlockSpec((1, tq_attn, E), lambda b, i: (b, i, 0))
    full_kv_spec = pl.BlockSpec((1, S_pad, E), lambda b, i: (b, 0, 0))

    # ---- kernel 1: LN1 + fused QKV ------------------------------------------
    q, k, v = pl.pallas_call(
        functools.partial(_ln1_qkv_kernel, eps=eps, embed_dim=E),
        out_shape=(
            jax.ShapeDtypeStruct((B, S_pad, E), cdt),
            jax.ShapeDtypeStruct((B, S_pad, E), cdt),
            jax.ShapeDtypeStruct((B, S_pad, E), cdt),
        ),
        grid_spec=pltpu.PrefetchScalarGridSpec(
            num_scalar_prefetch=0,
            grid=(B, S_pad // tq_qkv),
            in_specs=[
                seq_spec_qkv,                              # hidden_states tile
                wspec((1, E)), wspec((1, E)),              # ln1 gamma/beta
                wspec((E, 3 * E)), wspec((1, 3 * E)),      # fused QKV
            ],
            out_specs=[seq_spec_qkv, seq_spec_qkv, seq_spec_qkv],
        ),
        compiler_params=cparams,
    )(x_in, g1, b1, w_qkv, b_qkv)

    # ---- kernel 2: attention + out-proj + residual + LN2 + MLP + residual ----
    out = pl.pallas_call(
        functools.partial(_attn_mlp_kernel, num_heads=H, head_dim=hd,
                          eps=eps, valid_len=S),
        out_shape=jax.ShapeDtypeStruct((B, S_pad, E), hidden_states.dtype),
        grid_spec=pltpu.PrefetchScalarGridSpec(
            num_scalar_prefetch=0,
            grid=(B, S_pad // tq_attn),
            in_specs=[
                seq_spec_attn,                             # residual (original x)
                seq_spec_attn,                             # q tile
                full_kv_spec,                              # k (full sequence)
                full_kv_spec,                              # v (full sequence)
                wspec((E, E)), wspec((1, E)),              # out_proj
                wspec((1, E)), wspec((1, E)),              # ln2 gamma/beta
                wspec((E, I)), wspec((1, I)),              # fc1
                wspec((I, E)), wspec((1, E)),              # fc2
            ],
            out_specs=seq_spec_attn,
        ),
        compiler_params=cparams,
    )(x_in, q, k, v, wo, bo, g2, b2, w1, bb1, w2, bb2)

    if S_pad != S:
        out = out[:, :S, :]
    return out


def siglip_encoder_layer(hidden_states, params, *, num_heads, eps=1e-6,
                         qkv_seq_block=256, attn_seq_block=128,
                         compute_dtype=jnp.bfloat16,
                         vmem_limit_bytes=None,
                         single_buffer_weights=True):
    """hidden_states: (B, S, E).  params: PyTorch-layout weights (Linear as (out, in))."""
    kwargs = dict(num_heads=num_heads, eps=eps, qkv_seq_block=qkv_seq_block,
                  attn_seq_block=attn_seq_block, compute_dtype=compute_dtype,
                  vmem_limit_bytes=vmem_limit_bytes)
    try:
        return _forward(hidden_states, params,
                        single_buffer_weights=single_buffer_weights, **kwargs)
    except Exception:
        if not single_buffer_weights:
            raise
        # Fallback: some jax versions reject single-buffered weight specs.
        return _forward(hidden_states, params,
                        single_buffer_weights=False, **kwargs)


# ---------------------------------------------------------------------------
# Plain-JAX reference (mirrors the PyTorch SiglipEncoderLayer forward)
# ---------------------------------------------------------------------------
def _reference(x, params, *, num_heads, eps=1e-6):
    B, S, E = x.shape
    H = num_heads
    hd = E // H
    scale = hd ** (-0.5)

    def ln(v, g, b):
        mu = v.mean(-1, keepdims=True)
        var = ((v - mu) ** 2).mean(-1, keepdims=True)
        return (v - mu) / jnp.sqrt(var + eps) * g + b

    def lin(v, w, b):
        return v @ w.T + b

    h = ln(x, params["ln1_g"], params["ln1_b"])
    q = lin(h, params["q_w"], params["q_b"]).reshape(B, S, H, hd).transpose(0, 2, 1, 3)
    k = lin(h, params["k_w"], params["k_b"]).reshape(B, S, H, hd).transpose(0, 2, 1, 3)
    v = lin(h, params["v_w"], params["v_b"]).reshape(B, S, H, hd).transpose(0, 2, 1, 3)
    a = jnp.einsum("bhqd,bhkd->bhqk", q, k) * scale
    a = jax.nn.softmax(a.astype(jnp.float32), axis=-1).astype(q.dtype)
    o = jnp.einsum("bhqk,bhkd->bhqd", a, v).transpose(0, 2, 1, 3).reshape(B, S, E)
    o = lin(o, params["o_w"], params["o_b"])
    h1 = x + o

    z = ln(h1, params["ln2_g"], params["ln2_b"])
    u = lin(z, params["fc1_w"], params["fc1_b"])
    u = 0.5 * u * (1.0 + jnp.tanh(0.7978845608028654 * (u + 0.044715 * u ** 3)))
    y = lin(u, params["fc2_w"], params["fc2_b"])
    return h1 + y


if __name__ == "__main__":
    # Small config consistent with the module: hidden=32, heads=4 (head_dim=8),
    # intermediate=64, batch=2, seq=8.
    B, S, E, H, I = 2, 8, 32, 4, 64

    key = jax.random.PRNGKey(0)
    ks = jax.random.split(key, 17)
    x = jax.random.normal(ks[0], (B, S, E), dtype=jnp.float32)
    params = {
        "q_w": jax.random.normal(ks[1], (E, E), jnp.float32) * 0.05,
        "q_b": jax.random.normal(ks[2], (E,), jnp.float32) * 0.05,
        "k_w": jax.random.normal(ks[3], (E, E), jnp.float32) * 0.05,
        "k_b": jax.random.normal(ks[4], (E,), jnp.float32) * 0.05,
        "v_w": jax.random.normal(ks[5], (E, E), jnp.float32) * 0.05,
        "v_b": jax.random.normal(ks[6], (E,), jnp.float32) * 0.05,
        "o_w": jax.random.normal(ks[7], (E, E), jnp.float32) * 0.05,
        "o_b": jax.random.normal(ks[8], (E,), jnp.float32) * 0.05,
        "fc1_w": jax.random.normal(ks[9], (I, E), jnp.float32) * 0.05,
        "fc1_b": jax.random.normal(ks[10], (I,), jnp.float32) * 0.05,
        "fc2_w": jax.random.normal(ks[11], (E, I), jnp.float32) * 0.05,
        "fc2_b": jax.random.normal(ks[12], (E,), jnp.float32) * 0.05,
        "ln1_g": 1.0 + 0.1 * jax.random.normal(ks[13], (E,), jnp.float32),
        "ln1_b": 0.1 * jax.random.normal(ks[14], (E,), jnp.float32),
        "ln2_g": 1.0 + 0.1 * jax.random.normal(ks[15], (E,), jnp.float32),
        "ln2_b": 0.1 * jax.random.normal(ks[16], (E,), jnp.float32),
    }

    ref = _reference(x, params, num_heads=H)

    # f32 compute path (matches PyTorch semantics; tolerance allows the
    # approximate EUP reciprocal in the softmax).
    out_f32 = siglip_encoder_layer(x, params, num_heads=H,
                                   compute_dtype=jnp.float32)
    jax.block_until_ready(out_f32)
    assert out_f32.shape == (B, S, E)
    assert jnp.allclose(out_f32, ref, atol=3e-3, rtol=3e-3)

    # Default bf16-operand compute path (MXU-native), f32 accumulation.
    out_bf16 = siglip_encoder_layer(x, params, num_heads=H)
    jax.block_until_ready(out_bf16)
    assert out_bf16.shape == (B, S, E)
    assert jnp.allclose(out_bf16, ref, atol=6e-2, rtol=6e-2)

    print("KERNEL_OK")
</pallas_src>

<mosaic_0001>
module attributes {stable_mosaic.version = 11 : i64} {
  func.func @_ln1_qkv_kernel(%arg0: i32, %arg1: i32, %arg2: memref<1x8x32xf32, #tpu.memory_space<vmem>>, %arg3: memref<1x32xf32, #tpu.memory_space<vmem>>, %arg4: memref<1x32xf32, #tpu.memory_space<vmem>>, %arg5: memref<32x96xf32, #tpu.memory_space<vmem>>, %arg6: memref<1x96xf32, #tpu.memory_space<vmem>>, %arg7: memref<1x8x32xf32, #tpu.memory_space<vmem>>, %arg8: memref<1x8x32xf32, #tpu.memory_space<vmem>>, %arg9: memref<1x8x32xf32, #tpu.memory_space<vmem>>) attributes {dimension_semantics = [#tpu.dimension_semantics<parallel>, #tpu.dimension_semantics<parallel>], iteration_bounds = array<i64: 2, 1>, scalar_prefetch = 0 : i64, scratch_operands = 0 : i64, tpu.core_type = #tpu.core_type<tc>, window_params = [{transform_indices = @transform_0, window_bounds = array<i64: 1, 8, 32>}, {pipeline_mode = #tpu.pipeline_mode<synchronous>, transform_indices = @transform_1, window_bounds = array<i64: 1, 32>}, {pipeline_mode = #tpu.pipeline_mode<synchronous>, transform_indices = @transform_2, window_bounds = array<i64: 1, 32>}, {pipeline_mode = #tpu.pipeline_mode<synchronous>, transform_indices = @transform_3, window_bounds = array<i64: 32, 96>}, {pipeline_mode = #tpu.pipeline_mode<synchronous>, transform_indices = @transform_4, window_bounds = array<i64: 1, 96>}, {transform_indices = @transform_5, window_bounds = array<i64: 1, 8, 32>}, {transform_indices = @transform_6, window_bounds = array<i64: 1, 8, 32>}, {transform_indices = @transform_7, window_bounds = array<i64: 1, 8, 32>}]} {
    %c0 = arith.constant 0 : index
    %c0_0 = arith.constant 0 : index
    %c0_1 = arith.constant 0 : index
    %0 = vector.load %arg2[%c0, %c0_0, %c0_1] : memref<1x8x32xf32, #tpu.memory_space<vmem>>, vector<1x8x32xf32>
    %1 = vector.shape_cast %0 : vector<1x8x32xf32> to vector<8x32xf32>
    %c0_2 = arith.constant 0 : index
    %c0_3 = arith.constant 0 : index
    %2 = vector.load %arg3[%c0_2, %c0_3] : memref<1x32xf32, #tpu.memory_space<vmem>>, vector<1x32xf32>
    %c0_4 = arith.constant 0 : index
    %c0_5 = arith.constant 0 : index
    %3 = vector.load %arg4[%c0_4, %c0_5] : memref<1x32xf32, #tpu.memory_space<vmem>>, vector<1x32xf32>
    %cst = arith.constant dense<0.000000e+00> : vector<8xf32>
    %4 = vector.multi_reduction <add>, %1, %cst [1] : vector<8x32xf32> to vector<8xf32>
    %5 = vector.shape_cast %4 : vector<8xf32> to vector<8x1xf32>
    %cst_6 = arith.constant 3.200000e+01 : f32
    %6 = vector.broadcast %cst_6 : f32 to vector<8x1xf32>
    %7 = arith.divf %5, %6 : vector<8x1xf32>
    %8 = vector.broadcast %7 : vector<8x1xf32> to vector<8x32xf32>
    %9 = arith.subf %1, %8 : vector<8x32xf32>
    %10 = arith.mulf %9, %9 : vector<8x32xf32>
    %cst_7 = arith.constant dense<0.000000e+00> : vector<8xf32>
    %11 = vector.multi_reduction <add>, %10, %cst_7 [1] : vector<8x32xf32> to vector<8xf32>
    %12 = vector.shape_cast %11 : vector<8xf32> to vector<8x1xf32>
    %cst_8 = arith.constant 3.200000e+01 : f32
    %13 = vector.broadcast %cst_8 : f32 to vector<8x1xf32>
    %14 = arith.divf %12, %13 : vector<8x1xf32>
    %cst_9 = arith.constant 9.99999997E-7 : f32
    %15 = vector.broadcast %cst_9 : f32 to vector<8x1xf32>
    %16 = arith.addf %14, %15 : vector<8x1xf32>
    %17 = math.rsqrt %16 : vector<8x1xf32>
    %18 = vector.broadcast %7 : vector<8x1xf32> to vector<8x32xf32>
    %19 = arith.subf %1, %18 : vector<8x32xf32>
    %20 = vector.broadcast %17 : vector<8x1xf32> to vector<8x32xf32>
    %21 = arith.mulf %19, %20 : vector<8x32xf32>
    %22 = vector.broadcast %2 : vector<1x32xf32> to vector<8x32xf32>
    %23 = arith.mulf %21, %22 : vector<8x32xf32>
    %24 = vector.broadcast %3 : vector<1x32xf32> to vector<8x32xf32>
    %25 = arith.addf %23, %24 : vector<8x32xf32>
    %c0_10 = arith.constant 0 : index
    %c0_11 = arith.constant 0 : index
    %26 = vector.load %arg5[%c0_10, %c0_11] : memref<32x96xf32, #tpu.memory_space<vmem>>, vector<32x96xf32>
    %cst_12 = arith.constant dense<0.000000e+00> : vector<8x96xf32>
    %27 = tpu.matmul %25, %26, %cst_12 {dimension_numbers = #tpu.dot_dimension_numbers<[1], [0], [0], [1], [0, 0, 1, 1], [], []>} : vector<8x32xf32>, vector<32x96xf32>, vector<8x96xf32> -> vector<8x96xf32>
    %c0_13 = arith.constant 0 : index
    %c0_14 = arith.constant 0 : index
    %28 = vector.load %arg6[%c0_13, %c0_14] : memref<1x96xf32, #tpu.memory_space<vmem>>, vector<1x96xf32>
    %29 = vector.broadcast %28 : vector<1x96xf32> to vector<8x96xf32>
    %30 = arith.addf %27, %29 : vector<8x96xf32>
    %31 = vector.extract_strided_slice %30 {offsets = [0, 0], sizes = [8, 32], strides = [1, 1]} : vector<8x96xf32> to vector<8x32xf32>
    %c0_15 = arith.constant 0 : index
    %c0_16 = arith.constant 0 : index
    %c0_17 = arith.constant 0 : index
    %32 = vector.load %arg7[%c0_15, %c0_16, %c0_17] : memref<1x8x32xf32, #tpu.memory_space<vmem>>, vector<1x8x32xf32>
    %33 = vector.shape_cast %32 : vector<1x8x32xf32> to vector<8x32xf32>
    %34 = vector.shape_cast %31 : vector<8x32xf32> to vector<1x8x32xf32>
    tpu.vector_store %arg7[%c0_15, %c0_16, %c0_17], %34 {strides = array<i32>} : memref<1x8x32xf32, #tpu.memory_space<vmem>>, vector<1x8x32xf32>,
    %35 = vector.extract_strided_slice %30 {offsets = [0, 32], sizes = [8, 32], strides = [1, 1]} : vector<8x96xf32> to vector<8x32xf32>
    %c0_18 = arith.constant 0 : index
    %c0_19 = arith.constant 0 : index
    %c0_20 = arith.constant 0 : index
    %36 = vector.load %arg8[%c0_18, %c0_19, %c0_20] : memref<1x8x32xf32, #tpu.memory_space<vmem>>, vector<1x8x32xf32>
    %37 = vector.shape_cast %36 : vector<1x8x32xf32> to vector<8x32xf32>
    %38 = vector.shape_cast %35 : vector<8x32xf32> to vector<1x8x32xf32>
    tpu.vector_store %arg8[%c0_18, %c0_19, %c0_20], %38 {strides = array<i32>} : memref<1x8x32xf32, #tpu.memory_space<vmem>>, vector<1x8x32xf32>,
    %39 = vector.extract_strided_slice %30 {offsets = [0, 64], sizes = [8, 32], strides = [1, 1]} : vector<8x96xf32> to vector<8x32xf32>
    %c0_21 = arith.constant 0 : index
    %c0_22 = arith.constant 0 : index
    %c0_23 = arith.constant 0 : index
    %40 = vector.load %arg9[%c0_21, %c0_22, %c0_23] : memref<1x8x32xf32, #tpu.memory_space<vmem>>, vector<1x8x32xf32>
    %41 = vector.shape_cast %40 : vector<1x8x32xf32> to vector<8x32xf32>
    %42 = vector.shape_cast %39 : vector<8x32xf32> to vector<1x8x32xf32>
    tpu.vector_store %arg9[%c0_21, %c0_22, %c0_23], %42 {strides = array<i32>} : memref<1x8x32xf32, #tpu.memory_space<vmem>>, vector<1x8x32xf32>,
    return
  }
  func.func @transform_0(%arg0: i32, %arg1: i32) -> (i32, i32, i32) {
    %c0_i32 = arith.constant 0 : i32
    %c0_i32_0 = arith.constant 0 : i32
    return %arg0, %arg1, %c0_i32 : i32, i32, i32
  }
  func.func @transform_1(%arg0: i32, %arg1: i32) -> (i32, i32) {
    %c0_i32 = arith.constant 0 : i32
    %c0_i32_0 = arith.constant 0 : i32
    %c0_i32_1 = arith.constant 0 : i32
    return %c0_i32, %c0_i32_0 : i32, i32
  }
  func.func @transform_2(%arg0: i32, %arg1: i32) -> (i32, i32) {
    %c0_i32 = arith.constant 0 : i32
    %c0_i32_0 = arith.constant 0 : i32
    %c0_i32_1 = arith.constant 0 : i32
    return %c0_i32, %c0_i32_0 : i32, i32
  }
  func.func @transform_3(%arg0: i32, %arg1: i32) -> (i32, i32) {
    %c0_i32 = arith.constant 0 : i32
    %c0_i32_0 = arith.constant 0 : i32
    %c0_i32_1 = arith.constant 0 : i32
    return %c0_i32, %c0_i32_0 : i32, i32
  }
  func.func @transform_4(%arg0: i32, %arg1: i32) -> (i32, i32) {
    %c0_i32 = arith.constant 0 : i32
    %c0_i32_0 = arith.constant 0 : i32
    %c0_i32_1 = arith.constant 0 : i32
    return %c0_i32, %c0_i32_0 : i32, i32
  }
  func.func @transform_5(%arg0: i32, %arg1: i32) -> (i32, i32, i32) {
    %c0_i32 = arith.constant 0 : i32
    %c0_i32_0 = arith.constant 0 : i32
    return %arg0, %arg1, %c0_i32 : i32, i32, i32
  }
  func.func @transform_6(%arg0: i32, %arg1: i32) -> (i32, i32, i32) {
    %c0_i32 = arith.constant 0 : i32
    %c0_i32_0 = arith.constant 0 : i32
    return %arg0, %arg1, %c0_i32 : i32, i32, i32
  }
  func.func @transform_7(%arg0: i32, %arg1: i32) -> (i32, i32, i32) {
    %c0_i32 = arith.constant 0 : i32
    %c0_i32_0 = arith.constant 0 : i32
    return %arg0, %arg1, %c0_i32 : i32, i32, i32
  }
}

module attributes {stable_mosaic.version = 11 : i64} {
  func.func @_ln1_qkv_kernel(%arg0: i32, %arg1: i32, %arg2: memref<1x8x32xf32, #tpu.memory_space<vmem>>, %arg3: memref<1x32xf32, #tpu.memory_space<vmem>>, %arg4: memref<1x32xf32, #tpu.memory_space<vmem>>, %arg5: memref<32x96xf32, #tpu.memory_space<vmem>>, %arg6: memref<1x96xf32, #tpu.memory_space<vmem>>, %arg7: memref<1x8x32xf32, #tpu.memory_space<vmem>>, %arg8: memref<1x8x32xf32, #tpu.memory_space<vmem>>, %arg9: memref<1x8x32xf32, #tpu.memory_space<vmem>>) attributes {dimension_semantics = [#tpu.dimension_semantics<parallel>, #tpu.dimension_semantics<parallel>], iteration_bounds = array<i64: 2, 1>, scalar_prefetch = 0 : i64, scratch_operands = 0 : i64, tpu.core_type = #tpu.core_type<tc>, window_params = [{transform_indices = @transform_0, window_bounds = array<i64: 1, 8, 32>}, {pipeline_mode = #tpu.pipeline_mode<synchronous>, transform_indices = @transform_1, window_bounds = array<i64: 1, 32>}, {pipeline_mode = #tpu.pipeline_mode<synchronous>, transform_indices = @transform_2, window_bounds = array<i64: 1, 32>}, {pipeline_mode = #tpu.pipeline_mode<synchronous>, transform_indices = @transform_3, window_bounds = array<i64: 32, 96>}, {pipeline_mode = #tpu.pipeline_mode<synchronous>, transform_indices = @transform_4, window_bounds = array<i64: 1, 96>}, {transform_indices = @transform_5, window_bounds = array<i64: 1, 8, 32>}, {transform_indices = @transform_6, window_bounds = array<i64: 1, 8, 32>}, {transform_indices = @transform_7, window_bounds = array<i64: 1, 8, 32>}]} {
    %c0 = arith.constant 0 : index
    %c0_0 = arith.constant 0 : index
    %c0_1 = arith.constant 0 : index
    %0 = vector.load %arg2[%c0, %c0_0, %c0_1] : memref<1x8x32xf32, #tpu.memory_space<vmem>>, vector<1x8x32xf32>
    %1 = vector.shape_cast %0 : vector<1x8x32xf32> to vector<8x32xf32>
    %c0_2 = arith.constant 0 : index
    %c0_3 = arith.constant 0 : index
    %2 = vector.load %arg3[%c0_2, %c0_3] : memref<1x32xf32, #tpu.memory_space<vmem>>, vector<1x32xf32>
    %c0_4 = arith.constant 0 : index
    %c0_5 = arith.constant 0 : index
    %3 = vector.load %arg4[%c0_4, %c0_5] : memref<1x32xf32, #tpu.memory_space<vmem>>, vector<1x32xf32>
    %cst = arith.constant dense<0.000000e+00> : vector<8xf32>
    %4 = vector.multi_reduction <add>, %1, %cst [1] : vector<8x32xf32> to vector<8xf32>
    %5 = vector.shape_cast %4 : vector<8xf32> to vector<8x1xf32>
    %cst_6 = arith.constant 3.200000e+01 : f32
    %6 = vector.broadcast %cst_6 : f32 to vector<8x1xf32>
    %7 = arith.divf %5, %6 : vector<8x1xf32>
    %8 = vector.broadcast %7 : vector<8x1xf32> to vector<8x32xf32>
    %9 = arith.subf %1, %8 : vector<8x32xf32>
    %10 = arith.mulf %9, %9 : vector<8x32xf32>
    %cst_7 = arith.constant dense<0.000000e+00> : vector<8xf32>
    %11 = vector.multi_reduction <add>, %10, %cst_7 [1] : vector<8x32xf32> to vector<8xf32>
    %12 = vector.shape_cast %11 : vector<8xf32> to vector<8x1xf32>
    %cst_8 = arith.constant 3.200000e+01 : f32
    %13 = vector.broadcast %cst_8 : f32 to vector<8x1xf32>
    %14 = arith.divf %12, %13 : vector<8x1xf32>
    %cst_9 = arith.constant 9.99999997E-7 : f32
    %15 = vector.broadcast %cst_9 : f32 to vector<8x1xf32>
    %16 = arith.addf %14, %15 : vector<8x1xf32>
    %17 = math.rsqrt %16 : vector<8x1xf32>
    %18 = vector.broadcast %7 : vector<8x1xf32> to vector<8x32xf32>
    %19 = arith.subf %1, %18 : vector<8x32xf32>
    %20 = vector.broadcast %17 : vector<8x1xf32> to vector<8x32xf32>
    %21 = arith.mulf %19, %20 : vector<8x32xf32>
    %22 = vector.broadcast %2 : vector<1x32xf32> to vector<8x32xf32>
    %23 = arith.mulf %21, %22 : vector<8x32xf32>
    %24 = vector.broadcast %3 : vector<1x32xf32> to vector<8x32xf32>
    %25 = arith.addf %23, %24 : vector<8x32xf32>
    %c0_10 = arith.constant 0 : index
    %c0_11 = arith.constant 0 : index
    %26 = vector.load %arg5[%c0_10, %c0_11] : memref<32x96xf32, #tpu.memory_space<vmem>>, vector<32x96xf32>
    %cst_12 = arith.constant dense<0.000000e+00> : vector<8x96xf32>
    %27 = tpu.matmul %25, %26, %cst_12 {dimension_numbers = #tpu.dot_dimension_numbers<[1], [0], [0], [1], [0, 0, 1, 1], [], []>} : vector<8x32xf32>, vector<32x96xf32>, vector<8x96xf32> -> vector<8x96xf32>
    %c0_13 = arith.constant 0 : index
    %c0_14 = arith.constant 0 : index
    %28 = vector.load %arg6[%c0_13, %c0_14] : memref<1x96xf32, #tpu.memory_space<vmem>>, vector<1x96xf32>
    %29 = vector.broadcast %28 : vector<1x96xf32> to vector<8x96xf32>
    %30 = arith.addf %27, %29 : vector<8x96xf32>
    %31 = vector.extract_strided_slice %30 {offsets = [0, 0], sizes = [8, 32], strides = [1, 1]} : vector<8x96xf32> to vector<8x32xf32>
    %c0_15 = arith.constant 0 : index
    %c0_16 = arith.constant 0 : index
    %c0_17 = arith.constant 0 : index
    %32 = vector.load %arg7[%c0_15, %c0_16, %c0_17] : memref<1x8x32xf32, #tpu.memory_space<vmem>>, vector<1x8x32xf32>
    %33 = vector.shape_cast %32 : vector<1x8x32xf32> to vector<8x32xf32>
    %34 = vector.shape_cast %31 : vector<8x32xf32> to vector<1x8x32xf32>
    tpu.vector_store %arg7[%c0_15, %c0_16, %c0_17], %34 {strides = array<i32>} : memref<1x8x32xf32, #tpu.memory_space<vmem>>, vector<1x8x32xf32>,
    %35 = vector.extract_strided_slice %30 {offsets = [0, 32], sizes = [8, 32], strides = [1, 1]} : vector<8x96xf32> to vector<8x32xf32>
    %c0_18 = arith.constant 0 : index
    %c0_19 = arith.constant 0 : index
    %c0_20 = arith.constant 0 : index
    %36 = vector.load %arg8[%c0_18, %c0_19, %c0_20] : memref<1x8x32xf32, #tpu.memory_space<vmem>>, vector<1x8x32xf32>
    %37 = vector.shape_cast %36 : vector<1x8x32xf32> to vector<8x32xf32>
    %38 = vector.shape_cast %35 : vector<8x32xf32> to vector<1x8x32xf32>
    tpu.vector_store %arg8[%c0_18, %c0_19, %c0_20], %38 {strides = array<i32>} : memref<1x8x32xf32, #tpu.memory_space<vmem>>, vector<1x8x32xf32>,
    %39 = vector.extract_strided_slice %30 {offsets = [0, 64], sizes = [8, 32], strides = [1, 1]} : vector<8x96xf32> to vector<8x32xf32>
    %c0_21 = arith.constant 0 : index
    %c0_22 = arith.constant 0 : index
    %c0_23 = arith.constant 0 : index
    %40 = vector.load %arg9[%c0_21, %c0_22, %c0_23] : memref<1x8x32xf32, #tpu.memory_space<vmem>>, vector<1x8x32xf32>
    %41 = vector.shape_cast %40 : vector<1x8x32xf32> to vector<8x32xf32>
    %42 = vector.shape_cast %39 : vector<8x32xf32> to vector<1x8x32xf32>
    tpu.vector_store %arg9[%c0_21, %c0_22, %c0_23], %42 {strides = array<i32>} : memref<1x8x32xf32, #tpu.memory_space<vmem>>, vector<1x8x32xf32>,
    return
  }
  func.func @transform_0(%arg0: i32, %arg1: i32) -> (i32, i32, i32) {
    %c0_i32 = arith.constant 0 : i32
    %c0_i32_0 = arith.constant 0 : i32
    return %arg0, %arg1, %c0_i32 : i32, i32, i32
  }
  func.func @transform_1(%arg0: i32, %arg1: i32) -> (i32, i32) {
    %c0_i32 = arith.constant 0 : i32
    %c0_i32_0 = arith.constant 0 : i32
    %c0_i32_1 = arith.constant 0 : i32
    return %c0_i32, %c0_i32_0 : i32, i32
  }
  func.func @transform_2(%arg0: i32, %arg1: i32) -> (i32, i32) {
    %c0_i32 = arith.constant 0 : i32
    %c0_i32_0 = arith.constant 0 : i32
    %c0_i32_1 = arith.constant 0 : i32
    return %c0_i32, %c0_i32_0 : i32, i32
  }
  func.func @transform_3(%arg0: i32, %arg1: i32) -> (i32, i32) {
    %c0_i32 = arith.constant 0 : i32
    %c0_i32_0 = arith.constant 0 : i32
    %c0_i32_1 = arith.constant 0 : i32
    return %c0_i32, %c0_i32_0 : i32, i32
  }
  func.func @transform_4(%arg0: i32, %arg1: i32) -> (i32, i32) {
    %c0_i32 = arith.constant 0 : i32
    %c0_i32_0 = arith.constant 0 : i32
    %c0_i32_1 = arith.constant 0 : i32
    return %c0_i32, %c0_i32_0 : i32, i32
  }
  func.func @transform_5(%arg0: i32, %arg1: i32) -> (i32, i32, i32) {
    %c0_i32 = arith.constant 0 : i32
    %c0_i32_0 = arith.constant 0 : i32
    return %arg0, %arg1, %c0_i32 : i32, i32, i32
  }
  func.func @transform_6(%arg0: i32, %arg1: i32) -> (i32, i32, i32) {
    %c0_i32 = arith.constant 0 : i32
    %c0_i32_0 = arith.constant 0 : i32
    return %arg0, %arg1, %c0_i32 : i32, i32, i32
  }
  func.func @transform_7(%arg0: i32, %arg1: i32) -> (i32, i32, i32) {
    %c0_i32 = arith.constant 0 : i32
    %c0_i32_0 = arith.constant 0 : i32
    return %arg0, %arg1, %c0_i32 : i32, i32, i32
  }
}

</mosaic_0001>

<bundles_post_ra>
// kernel: tpu_custom_call.1
= control target key start
LH: loop header
LB: loop body
LE: loop exit
PB: predicated region body
PF: predicated region fallthrough
CT: control target
= control target key end

     0   :  { %s1315_s0 = inlined_call_operand.hbm [shape: f32[2,8,32], index: 0, kind: input, shape index: {}]   ;;  %s1316_s1 = inlined_call_operand.vmem [shape: f32[1,32], index: 1, kind: input, shape index: {}]   ;;  %s1317_s2 = inlined_call_operand.vmem [shape: f32[1,32], index: 2, kind: input, shape index: {}]   ;;  %s1318_s3 = inlined_call_operand.hbm [shape: f32[32,96], index: 3, kind: input, shape index: {}]   ;;  %s1319_s4 = inlined_call_operand.vmem [shape: f32[1,96], index: 4, kind: input, shape index: {}]   ;;  %s1320_s5 = inlined_call_operand.hbm [shape: f32[2,8,32], index: 5, kind: output, shape index: {0}]   ;;  %s1321_s6 = inlined_call_operand.hbm [shape: f32[2,8,32], index: 6, kind: output, shape index: {1}]   ;;  %s1322_s7 = inlined_call_operand.hbm [shape: f32[2,8,32], index: 7, kind: output, shape index: {2}]  }
   0x1   :  { %1328 = sst [smem:[#allocation18_spill]] %s1318_s3 }
   0x2   :  { %13 = vsyncpa [#allocation3], 0 }
   0x3   :  { %15 = vsyncpa [#allocation3 + $0x1], 0 }
   0x4   :  { %16 = vsyncpa [#allocation6], 0 }
   0x5   :  { %17 = vsyncpa [#allocation4], 0 }
   0x6   :  { %19 = vsyncpa [#allocation4 + $0x1], 0 }
   0x7   :  { %20 = vsyncpa [#allocation9], 0 }
   0x8   :  { %22 = vsyncpa [#allocation9 + $0x1], 0  ;;  %s1059_s24 = smov 0   ;;  %s1061_s25 = smov 0  }
   0x9   :  { %s1063_s26 = smov 0   ;;  %s1065_s27 = smov 0  }
   0xa   :  { %s1067_s28 = smov 0   ;;  %s1069_s29 = smov 0  }
   0xb LB: > { %1329 = sst [smem:[#allocation15_spill]] %s1002_s28  ;;  %s1090_s30 = sadd.s32 4294967295, %s1006_s29   ;;  %s1006_s29 = sphi %s1069_s29, %s28_s29   ;;  %s1002_s28 = sphi %s1067_s28, %s1348_s28   ;;  %s998_s27 = sphi %s1065_s27, %s1347_s27   ;;  %s994_s26 = sphi %s1063_s26, %s1351_s26   ;;  %s990_s25 = sphi %s1061_s25, %s1350_s25   ;;  %s986_s24 = sphi %s1059_s24, %s1349_s24  }
   0xc   : > { %s1323_s8 = sadd.s32 4294967294, %s1006_s29   ;;  %p62_p0 = scmp.ne.s32.totalorder %s990_s25, %s986_s24 }
   0xd   : > { %p1327_p1 = scmp.eq.s32.totalorder %s1090_s30, 0  ;;  %p178_p3 = scmp.eq.s32.totalorder %s1323_s8, 1 }
   0xe   : > { %p682_p5 = scmp.ge.s32.totalorder %s1006_s29, 1  ;;  %p241_p7 = scmp.lt.s32.totalorder %s1006_s29, 3 }
   0xf   : > { %p1101_p4 = por %p1327_p1, %p62_p0  ;;  %p1106_p6 = por %p178_p3, %p62_p0 }
  0x10   : > { %p1111_p8 = pnand %p682_p5, %p241_p7  ;;  %s1008_s12 = smov [#allocation5]  }
  0x11   : > { %s1331_s10 = scalar_select %p1106_p6, 1, 0 }
  0x12   : > { %s259_s13 = sshll.u32 %s1008_s12, 4  ;;  %p733_p9 = pneg %p1111_p8  ;;  %s260_s13 = int_to_ptr.vmem [resolvable:$true] %s259_s13 }
  0x13   : > { %1332 = sst [smem:[#allocation16_spill]] %s1331_s10  ;;  %s40_s15 = sadd.s32 1, %s1002_s28 }
  0x14   : > { %p1120_p11 = pnand %p733_p9, %p1327_p1  ;;  %s823_s16 = scalar_lea.vmem %s260_s13, 512 }
  0x15   : > { %p824_p13 = scmp.ne.s32.totalorder %s260_s13, %s823_s16  ;;  %p831_p5 = scmp.lt.s32.totalorder %s260_s13, %s260_s13 }
  0x16   : > { %p814_p12 = pneg %p1120_p11  ;;  %p832_p7 = scmp.lt.s32.totalorder %s823_s16, %s823_s16 }
  0x18   : > { %p826_p0 = pnand %p824_p13, %p814_p12  ;;  %p833_p2 = por %p832_p7, %p831_p5 }
  0x1a   : > { %p827_p3 = pneg %p826_p0 }
  0x1c   : > { %p834_p6 = pnand %p833_p2, %p827_p3 }
  0x1e   : > { %837 = shalt.err (!%p834_p6)
}
  0x1f   : > { %s1009_s17 = smov 128   ;;  %s1010_s18 = smov 8  }
  0x20   : > { %s1335_s3 = sld [smem:[#allocation18_spill]]  ;;  %p42_p2 = scmp.ge.s32.totalorder %s40_s15, 2 }
  0x21   : > { %s49_s21 = sadd.s32 1, %s994_s26  ;;  %p56_p6 = scmp.ne.s32.totalorder %s994_s26, %s990_s25 }
  0x22   : > { %p57_p9 = scmp.eq.s32.totalorder %s1006_s29, 0  ;;  %s1353_s15 = smov (%p42_p2, %s40_s15), 0 }
  0x23   : > { %1336 = sst [smem:[#allocation17_spill]] %s1353_s15  ;;  %p1338_p13 = scmp.eq.s32.totalorder %s1090_s30, 1 }
  0x24   : > { %p1138_p12 = por %p57_p9, %p56_p6  ;;  %s44_s12 = ssub.s32 %s1002_s28, %s1353_s15 }
  0x25   : > { %p1144_p0 = por %p1338_p13, %p56_p6  ;;  %p752_p3 = scmp.lt.s32.totalorder %s1006_s29, 2 }
  0x26   : > { %736 = dma.hbm_to_vmem [thread:$0]  (!%p1120_p11), %s1335_s3, 512, %s260_s13, [#allocation6], %s1009_s17, %s1009_s17, %s1010_s18  }
  0x27   : > { %p47_p11 = scmp.eq.s32.totalorder %s44_s12, 0  ;;  %s276_s13 = sand.u32 1, %s994_s26  }
  0x28   : > { %s685_s14 = sshll.u32 %s276_s13, 3  ;;  %s686_s17 = sshll.u32 %s1002_s28, 7 }
  0x29   : > { %s1153_s16 = scalar_select %p47_p11, %s994_s26, %s49_s21  }
  0x2a   : > { %s286_s20 = scalar_lea.hbm %s1315_s0, %s686_s17  ;;  %s280_s8 = scalar_lea.vmem [#allocation2], %s685_s14 }
  0x2b   : > { %s288_s3 = sshll.u32 %s280_s8, 4  ;;  %p1161_p5 = pnand %p752_p3, %p1138_p12  ;;  %s289_s3 = int_to_ptr.vmem [resolvable:$true] %s288_s3 }
  0x2c   : > { %s277_s15 = scalar_lea.sflag [#allocation3], %s276_s13  ;;  %s851_s12 = scalar_lea.vmem %s289_s3, 128 }
  0x2d   : > { %p840_p7 = pneg %p1161_p5  ;;  %p852_p2 = scmp.ne.s32.totalorder %s289_s3, %s851_s12 }
  0x2e   : > { %s1011_s21 = smov [#allocation2]  }
  0x2f   : > { %p854_p6 = pnand %p852_p2, %p840_p7  ;;  %s856_s28 = sshll.u32 %s1011_s21, 4  ;;  %s857_s28 = int_to_ptr.vmem [resolvable:$false] %s856_s28 }
  0x30   : > { %s858_s17 = scalar_lea.vmem %s857_s28, 256  ;;  %p859_p13 = scmp.lt.s32.totalorder %s289_s3, %s857_s28 }
  0x31   : > { %p855_p9 = pneg %p854_p6  ;;  %p860_p11 = scmp.lt.s32.totalorder %s858_s17, %s851_s12 }
  0x33   : > { %p861_p10 = por %p860_p11, %p859_p13 }
  0x35   : > { %p862_p1 = pnand %p861_p10, %p855_p9 }
  0x37   : > { %865 = shalt.err (!%p862_p1)
}
  0x38   : > { %740 = dma.hbm_to_vmem [thread:$0]  (!%p1161_p5), %s286_s20, 128, %s289_s3, %s277_s15  }
  0x39   : > { %297 = sbr.rel (%p1111_p8) target bundleno = 720 (0x2d0), region = 40  ;;  %s1172_s8 = sand.u32 (!%p1111_p8), 1, %s990_s25  }
  0x3a   : > { %s1175_s22 = sshll.u32 (!%p1111_p8), %s1172_s8, 3  ;;  %s300_s28 = scalar_lea.sflag (!%p1111_p8), [#allocation3], %s1172_s8 }
  0x3b   : > { %s303_s13 = scalar_lea.vmem (!%p1111_p8), [#allocation2], %s1175_s22 }
  0x3e   : > { %969 = dma.done.wait (%p1101_p4), %s300_s28, 128  }
  0x3f   : > { %971 = vsyncadd (%p1101_p4), %s300_s28, 4294967168  ;;  %p1341_p1 = scmp.eq.s32.totalorder %s1090_s30, 0 }
  0x41   : > { %973 = dma.done.wait (%p1341_p1), [#allocation6], 512   ;;  %p1342_p8 = pmov %p1341_p1 }
  0x42   : > { %vm351_vm0 = vcmask 261120   ;;  %v348_v0 = vld [vmem:[%s303_s13] sm:$0xff]  ;;  %v1012_v8 = vmov 0.0   ;;  %vm1013_vm1 = vmmov 0   ;;  %v381_v10 = vld [vmem:[#allocation5 + $0x8] sm:$0xff]  ;;  %v380_v11 = vld [vmem:[#allocation5] sm:$0xff] }
  0x43   : > { %975 = vsyncadd (%p1342_p8), [#allocation6], 4294966784  ;;  %v352_v1 = vsel %vm351_vm0, %v348_v0, 0.0  ;;  %v383_v7 = vld [vmem:[#allocation5 + $0x18] sm:$0xff]  ;;  %710 = vmatprep.subr.mxu0 %v1012_v8  ;;  %v382_v9 = vld [vmem:[#allocation5 + $0x10] sm:$0xff]  ;;  %718 = vmatprep.mubr.msk.f32.mxu0 %vm1013_vm1, %v1012_v8  ;;  %s1200_s18 = sshll.u32 %s998_s27, 7 }
  0x44   : > { %353 = vadd.xlane.f32.xlu0 %v352_v1  ;;  %711 = vmatpush3.msra.mxu0 %v383_v7  ;;  %v693_v16 = vld [vmem:[%s1316_s1] ss:$0 sm:$0xff]  ;;  %s333_s19 = scalar_lea.vmem [#allocation7], %s1175_s22  ;;  %s1207_s17 = scalar_lea.hbm %s1320_s5, %s1200_s18 }
  0x45   : > { %712 = vmatprep.subr.mxu0 %v1012_v8  ;;  %v694_v18 = vld [vmem:[%s1317_s2] ss:$0 sm:$0xff]  ;;  %s499_s20 = sshll.u32 %s333_s19, 4  ;;  %s1014_s28 = smov 96   ;;  %s1209_s20 = int_to_ptr.vmem [resolvable:$true] %s499_s20 }
  0x46   : > { %713 = vmatpush3.msra.mxu0 %v382_v9  ;;  %v695_v21 = vld [vmem:[%s1319_s4] ss:$0 sm:$0xff]  ;;  %s475_s27 = scalar_lea.sflag [#allocation4], %s1172_s8  ;;  %s866_s13 = scalar_lea.vmem %s1209_s20, 128 }
  0x47   : > { %714 = vmatprep.subr.mxu0 %v1012_v8  ;;  %p867_p4 = scmp.ne.s32.totalorder %s1209_s20, %s866_s13  ;;  %s1015_s3 = smov [#allocation7]  }
  0x48   : > { %715 = vmatpush3.msra.mxu0 %v381_v10  ;;  %s870_s9 = sshll.u32 %s1015_s3, 4  ;;  %s871_s9 = int_to_ptr.vmem [resolvable:$false] %s870_s9 }
  0x49   : > { %716 = vmatprep.subr.mxu0 %v1012_v8  ;;  %p868_p10 = pnand %p867_p4, %p1144_p0  ;;  %s872_s10 = scalar_lea.vmem %s871_s9, 256 }
  0x4a   : > { %717 = vmatpush3.msra.mxu0 %v380_v11  ;;  %p873_p3 = scmp.lt.s32.totalorder %s1209_s20, %s871_s9  ;;  %p874_p5 = scmp.lt.s32.totalorder %s872_s10, %s866_s13 }
  0x4b   : > { %p869_p12 = pneg %p868_p10 }
  0x4c   : > { %p875_p7 = por %p874_p5, %p873_p3 }
  0x4e   : > { %p876_p2 = pnand %p875_p7, %p869_p12 }
  0xcd   : > { %v354_v2 = vpop.xlane.xlu0 %353 }
  0xce   : > { %v356_v3 = vmul.f32 0.03125, %v354_v2 }
  0xd0   : > { %v357_v4 = vsub.f32 %v348_v0, %v356_v3 }
  0xd2   : > { %v358_v5 = vmul.f32 %v357_v4, %v357_v4 }
  0xd4   : > { %v359_v6 = vsel %vm351_vm0, %v358_v5, 0.0 }
  0xd5   : > { %360 = vadd.xlane.f32.xlu0 %v359_v6 }
 0x15e   : > { %v361_v12 = vpop.xlane.xlu0 %360 }
 0x15f   : > { %v362_v13 = vmul.f32 0.03125, %v361_v12 }
 0x161   : > { %v363_v14 = vadd.f32 1e-06, %v362_v13 }
 0x163   : > { %810 = vrsqrt.f32 %v363_v14 }
 0x170   : > { %v811_v15 = vpop.eup %810 }
 0x171   : > { %v365_v17 = vmul.f32 %v811_v15, %v357_v4 }
 0x173   : > { %v372_v19 = vmul.f32 %v693_v16, %v365_v17 }
 0x175   : > { %v379_v20 = vadd.f32 %v694_v18, %v372_v19 }
 0x177   : > { %719 = vmatmul.mubr.msk.f32.vlgmr.msra.gmra.mxu0 %vm351_vm0, %v379_v20 }
 0x237   : > { %v460_v22 = vpop.f32.mrf.mxu0 }
 0x238   : > { %v461_v23 = vadd.f32 %v695_v21, %v460_v22 }
 0x239   : > { %v720_v24 = vpop.f32.mrf.mxu0 }
 0x23a   : > { %466 = vrot.lane.b32.xlu1 %v461_v23, %s1014_s28  ;;  %464 = vst.msk [vmem:[%s333_s19] sm:$0xff] %vm351_vm0, %v461_v23 }
 0x23b   : > { %879 = shalt.err (!%p876_p2)
}
 0x23c   : > { %s880_s11 = scalar_lea.hbm %s1207_s17, 128  ;;  %s884_s14 = scalar_lea.hbm %s1320_s5, 256 }
 0x23d   : > { %p881_p6 = scmp.ne.s32.totalorder %s1207_s17, %s880_s11  ;;  %p885_p11 = scmp.lt.s32.totalorder %s1207_s17, %s1320_s5 }
 0x23e   : > { %p886_p1 = scmp.lt.s32.totalorder %s884_s14, %s880_s11 }
 0x23f   : > { %p882_p9 = pnand %p881_p6, %p1144_p0 }
 0x240   : > { %p887_p8 = por %p886_p1, %p885_p11 }
 0x241   : > { %p883_p13 = pneg %p882_p9 }
 0x243   : > { %p888_p4 = pnand %p887_p8, %p883_p13 }
 0x245   : > { %891 = shalt.err (!%p888_p4)
}
 0x246   : > { %727 = dma.vmem_to_hbm [thread:$0]  (%p1144_p0), %s1209_s20, 128, %s1207_s17, %s475_s27  }
 0x247   : > { %s1016_s21 = smov 64   ;;  %s479_s28 = sand.u32 1, %s1090_s30  }
 0x248   : > { %470 = vrot.lane.b32.xlu1 %v461_v23, %s1016_s21  ;;  %s340_s13 = scalar_lea.vmem [#allocation8], %s1175_s22  ;;  %s1239_s11 = scalar_lea.hbm %s1321_s6, %s1200_s18 }
 0x249   : > { %s513_s3 = sshll.u32 %s340_s13, 4  ;;  %s347_s8 = scalar_lea.vmem [#allocation10], %s1175_s22  ;;  %s1241_s3 = int_to_ptr.vmem [resolvable:$true] %s513_s3 }
 0x24a   : > { %s527_s15 = sshll.u32 %s347_s8, 4  ;;  %s1247_s20 = scalar_lea.sflag [#allocation9], %s479_s28  ;;  %s528_s15 = int_to_ptr.vmem [resolvable:$true] %s527_s15 }
 0x24b   : > { %s892_s30 = scalar_lea.vmem %s1241_s3, 128  ;;  %s1017_s17 = smov [#allocation8]  }
 0x24c   : > { %p893_p10 = scmp.ne.s32.totalorder %s1241_s3, %s892_s30  ;;  %s896_s27 = sshll.u32 %s1017_s17, 4  ;;  %s897_s27 = int_to_ptr.vmem [resolvable:$false] %s896_s27 }
 0x24d   : > { %s898_s14 = scalar_lea.vmem %s897_s27, 256  ;;  %p899_p5 = scmp.lt.s32.totalorder %s1241_s3, %s897_s27 }
 0x24e   : > { %p894_p12 = pnand %p893_p10, %p1144_p0  ;;  %p900_p7 = scmp.lt.s32.totalorder %s898_s14, %s892_s30 }
 0x250   : > { %p895_p3 = pneg %p894_p12  ;;  %p901_p2 = por %p900_p7, %p899_p5 }
 0x252   : > { %p902_p6 = pnand %p901_p2, %p895_p3 }
 0x2ac   : > { %v467_v25 = vpop.permute.xlu1 %466 }
 0x2ad   : > { %469 = vst.msk [vmem:[%s340_s13] sm:$0xff] %vm351_vm0, %v467_v25 }
 0x2ae   : > { %905 = shalt.err (!%p902_p6)
}
 0x2af   : > { %s906_s19 = scalar_lea.hbm %s1239_s11, 128  ;;  %s910_s28 = scalar_lea.hbm %s1321_s6, 256 }
 0x2b0   : > { %p907_p9 = scmp.ne.s32.totalorder %s1239_s11, %s906_s19  ;;  %p911_p1 = scmp.lt.s32.totalorder %s1239_s11, %s1321_s6 }
 0x2b1   : > { %p912_p8 = scmp.lt.s32.totalorder %s910_s28, %s906_s19 }
 0x2b2   : > { %p908_p13 = pnand %p907_p9, %p1144_p0 }
 0x2b3   : > { %p913_p4 = por %p912_p8, %p911_p1 }
 0x2b4   : > { %p909_p11 = pneg %p908_p13 }
 0x2b6   : > { %p914_p10 = pnand %p913_p4, %p909_p11 }
 0x2b8   : > { %917 = shalt.err (!%p914_p10)
}
 0x2b9   : > { %728 = dma.vmem_to_hbm [thread:$0]  (%p1144_p0), %s1241_s3, 128, %s1239_s11, %s1247_s20  }
 0x2ba   : > { %s525_s17 = scalar_lea.hbm %s1322_s7, %s1200_s18  ;;  %v471_v26 = vpop.permute.xlu1 %470  ;;  %s918_s27 = scalar_lea.vmem %s528_s15, 128 }
 0x2bb   : > { %473 = vst.msk [vmem:[%s347_s8] sm:$0xff] %vm351_vm0, %v471_v26  ;;  %p919_p12 = scmp.ne.s32.totalorder %s528_s15, %s918_s27  ;;  %s1018_s14 = smov [#allocation10]  }
 0x2bc   : > { %s922_s19 = sshll.u32 %s1018_s14, 4  ;;  %s923_s19 = int_to_ptr.vmem [resolvable:$false] %s922_s19 }
 0x2bd   : > { %p920_p3 = pnand %p919_p12, %p1144_p0  ;;  %s924_s12 = scalar_lea.vmem %s923_s19, 256 }
 0x2be   : > { %p925_p7 = scmp.lt.s32.totalorder %s528_s15, %s923_s19  ;;  %p926_p2 = scmp.lt.s32.totalorder %s924_s12, %s918_s27 }
 0x2bf   : > { %p921_p5 = pneg %p920_p3 }
 0x2c0   : > { %p927_p6 = por %p926_p2, %p925_p7 }
 0x2c2   : > { %p928_p9 = pnand %p927_p6, %p921_p5 }
 0x2c4   : > { %931 = shalt.err (!%p928_p9)
}
 0x2c5   : > { %s932_s18 = scalar_lea.hbm %s525_s17, 128  ;;  %s936_s11 = scalar_lea.hbm %s1322_s7, 256 }
 0x2c6   : > { %p933_p13 = scmp.ne.s32.totalorder %s525_s17, %s932_s18  ;;  %p937_p8 = scmp.lt.s32.totalorder %s525_s17, %s1322_s7 }
 0x2c7   : > { %p938_p4 = scmp.lt.s32.totalorder %s936_s11, %s932_s18 }
 0x2c8   : > { %p934_p11 = pnand %p933_p13, %p1144_p0 }
 0x2c9   : > { %p939_p10 = por %p938_p4, %p937_p8 }
 0x2ca   : > { %p935_p1 = pneg %p934_p11 }
 0x2cc   : > { %p940_p12 = pnand %p939_p10, %p935_p1 }
 0x2ce   : > { %943 = shalt.err (!%p940_p12)
}
 0x2cf   : > { %729 = dma.vmem_to_hbm [thread:$0]  (%p1144_p0), %s528_s15, 128, %s525_s17, %s1247_s20  }
 0x2d0 PF: > { %s1343_s28 = sld [smem:[#allocation16_spill]]  ;;  %s539_s13 = sand.u32 1, %s986_s24  }
 0x2d1   : > { %p1345_p5 = scmp.ge.s32.totalorder %s1006_s29, 2  ;;  %s540_s9 = scalar_lea.sflag [#allocation4], %s539_s13 }
 0x2d6   : > { %p1344_p3 = scmp.ne.s32.totalorder %s1343_s28, 0 }
 0x2d8   : > { %p742_p7 = pnand %p1345_p5, %p1344_p3 }
 0x2da   : > { %p743_p2 = pneg %p742_p7 }
 0x2dc   : > { %977 = dma.done.wait (%p743_p2), %s540_s9, 128  }
 0x2dd   : > { %979 = vsyncadd (%p743_p2), %s540_s9, 4294967168  ;;  %s1346_s10 = sadd.s32 4294967294, %s1006_s29  }
 0x2de   : > { %s548_s30 = sand.u32 1, %s1346_s10  }
 0x2df   : > { %s549_s27 = scalar_lea.sflag [#allocation9], %s548_s30 }
 0x2e0   : > { %981 = dma.done.wait (%p743_p2), %s549_s27, 256  }
 0x2e1   : > { %983 = vsyncadd (%p743_p2), %s549_s27, 4294967040  ;;  %s28_s29 = sadd.s32 1, %s1006_s29   ;;  %s1347_s27 = sld [smem:[#allocation15_spill]] }
 0x2e2   : > { %p25_p0 = scmp.ge.s32.totalorder %s28_s29, 4   ;;  %s1348_s28 = sld [smem:[#allocation17_spill]] }
 0x2e3   : > { %s1349_s24 = smov %s990_s25  ;;  %s1350_s25 = smov %s994_s26 }
 0x2e4   : > { %s1351_s26 = smov %s1153_s16  ;;  %27 = sbr.rel (!%p25_p0) target bundleno = 11 (0xb), region = 121 }
 0x2e9   :  { %563 = vsyncpa [#allocation3], 1 }
 0x2ea   :  { %565 = vsyncpa [#allocation3 + $0x1], 1 }
 0x2eb   :  { %566 = vsyncpa [#allocation6], 1 }
 0x2ec   :  { %567 = vsyncpa [#allocation4], 1 }
 0x2ed   :  { %569 = vsyncpa [#allocation4 + $0x1], 1 }
 0x2ee   :  { %570 = vsyncpa [#allocation9], 1 }
 0x2ef   :  { %572 = vsyncpa [#allocation9 + $0x1], 1 }

// kernel: tpu_custom_call.1
= control target key start
LH: loop header
LB: loop body
LE: loop exit
PB: predicated region body
PF: predicated region fallthrough
CT: control target
= control target key end

     0   :  { %s1315_s0 = inlined_call_operand.hbm [shape: f32[2,8,32], index: 0, kind: input, shape index: {}]   ;;  %s1316_s1 = inlined_call_operand.vmem [shape: f32[1,32], index: 1, kind: input, shape index: {}]   ;;  %s1317_s2 = inlined_call_operand.vmem [shape: f32[1,32], index: 2, kind: input, shape index: {}]   ;;  %s1318_s3 = inlined_call_operand.hbm [shape: f32[32,96], index: 3, kind: input, shape index: {}]   ;;  %s1319_s4 = inlined_call_operand.vmem [shape: f32[1,96], index: 4, kind: input, shape index: {}]   ;;  %s1320_s5 = inlined_call_operand.hbm [shape: f32[2,8,32], index: 5, kind: output, shape index: {0}]   ;;  %s1321_s6 = inlined_call_operand.hbm [shape: f32[2,8,32], index: 6, kind: output, shape index: {1}]   ;;  %s1322_s7 = inlined_call_operand.hbm [shape: f32[2,8,32], index: 7, kind: output, shape index: {2}]  }
   0x1   :  { %1328 = sst [smem:[#allocation18_spill]] %s1318_s3 }
   0x2   :  { %13 = vsyncpa [#allocation3], 0 }
   0x3   :  { %15 = vsyncpa [#allocation3 + $0x1], 0 }
   0x4   :  { %16 = vsyncpa [#allocation6], 0 }
   0x5   :  { %17 = vsyncpa [#allocation4], 0 }
   0x6   :  { %19 = vsyncpa [#allocation4 + $0x1], 0 }
   0x7   :  { %20 = vsyncpa [#allocation9], 0 }
   0x8   :  { %22 = vsyncpa [#allocation9 + $0x1], 0  ;;  %s1059_s24 = smov 0   ;;  %s1061_s25 = smov 0  }
   0x9   :  { %s1063_s26 = smov 0   ;;  %s1065_s27 = smov 0  }
   0xa   :  { %s1067_s28 = smov 0   ;;  %s1069_s29 = smov 0  }
   0xb LB: > { %1329 = sst [smem:[#allocation15_spill]] %s1002_s28  ;;  %s1090_s30 = sadd.s32 4294967295, %s1006_s29   ;;  %s1006_s29 = sphi %s1069_s29, %s28_s29   ;;  %s1002_s28 = sphi %s1067_s28, %s1348_s28   ;;  %s998_s27 = sphi %s1065_s27, %s1347_s27   ;;  %s994_s26 = sphi %s1063_s26, %s1351_s26   ;;  %s990_s25 = sphi %s1061_s25, %s1350_s25   ;;  %s986_s24 = sphi %s1059_s24, %s1349_s24  }
   0xc   : > { %s1323_s8 = sadd.s32 4294967294, %s1006_s29   ;;  %p62_p0 = scmp.ne.s32.totalorder %s990_s25, %s986_s24 }
   0xd   : > { %p1327_p1 = scmp.eq.s32.totalorder %s1090_s30, 0  ;;  %p178_p3 = scmp.eq.s32.totalorder %s1323_s8, 1 }
   0xe   : > { %p682_p5 = scmp.ge.s32.totalorder %s1006_s29, 1  ;;  %p241_p7 = scmp.lt.s32.totalorder %s1006_s29, 3 }
   0xf   : > { %p1101_p4 = por %p1327_p1, %p62_p0  ;;  %p1106_p6 = por %p178_p3, %p62_p0 }
  0x10   : > { %p1111_p8 = pnand %p682_p5, %p241_p7  ;;  %s1008_s12 = smov [#allocation5]  }
  0x11   : > { %s1331_s10 = scalar_select %p1106_p6, 1, 0 }
  0x12   : > { %s259_s13 = sshll.u32 %s1008_s12, 4  ;;  %p733_p9 = pneg %p1111_p8  ;;  %s260_s13 = int_to_ptr.vmem [resolvable:$true] %s259_s13 }
  0x13   : > { %1332 = sst [smem:[#allocation16_spill]] %s1331_s10  ;;  %s40_s15 = sadd.s32 1, %s1002_s28 }
  0x14   : > { %p1120_p11 = pnand %p733_p9, %p1327_p1  ;;  %s823_s16 = scalar_lea.vmem %s260_s13, 512 }
  0x15   : > { %p824_p13 = scmp.ne.s32.totalorder %s260_s13, %s823_s16  ;;  %p831_p5 = scmp.lt.s32.totalorder %s260_s13, %s260_s13 }
  0x16   : > { %p814_p12 = pneg %p1120_p11  ;;  %p832_p7 = scmp.lt.s32.totalorder %s823_s16, %s823_s16 }
  0x18   : > { %p826_p0 = pnand %p824_p13, %p814_p12  ;;  %p833_p2 = por %p832_p7, %p831_p5 }
  0x1a   : > { %p827_p3 = pneg %p826_p0 }
  0x1c   : > { %p834_p6 = pnand %p833_p2, %p827_p3 }
  0x1e   : > { %837 = shalt.err (!%p834_p6)
}
  0x1f   : > { %s1009_s17 = smov 128   ;;  %s1010_s18 = smov 8  }
  0x20   : > { %s1335_s3 = sld [smem:[#allocation18_spill]]  ;;  %p42_p2 = scmp.ge.s32.totalorder %s40_s15, 2 }
  0x21   : > { %s49_s21 = sadd.s32 1, %s994_s26  ;;  %p56_p6 = scmp.ne.s32.totalorder %s994_s26, %s990_s25 }
  0x22   : > { %p57_p9 = scmp.eq.s32.totalorder %s1006_s29, 0  ;;  %s1353_s15 = smov (%p42_p2, %s40_s15), 0 }
  0x23   : > { %1336 = sst [smem:[#allocation17_spill]] %s1353_s15  ;;  %p1338_p13 = scmp.eq.s32.totalorder %s1090_s30, 1 }
  0x24   : > { %p1138_p12 = por %p57_p9, %p56_p6  ;;  %s44_s12 = ssub.s32 %s1002_s28, %s1353_s15 }
  0x25   : > { %p1144_p0 = por %p1338_p13, %p56_p6  ;;  %p752_p3 = scmp.lt.s32.totalorder %s1006_s29, 2 }
  0x26   : > { %736 = dma.hbm_to_vmem [thread:$0]  (!%p1120_p11), %s1335_s3, 512, %s260_s13, [#allocation6], %s1009_s17, %s1009_s17, %s1010_s18  }
  0x27   : > { %p47_p11 = scmp.eq.s32.totalorder %s44_s12, 0  ;;  %s276_s13 = sand.u32 1, %s994_s26  }
  0x28   : > { %s685_s14 = sshll.u32 %s276_s13, 3  ;;  %s686_s17 = sshll.u32 %s1002_s28, 7 }
  0x29   : > { %s1153_s16 = scalar_select %p47_p11, %s994_s26, %s49_s21  }
  0x2a   : > { %s286_s20 = scalar_lea.hbm %s1315_s0, %s686_s17  ;;  %s280_s8 = scalar_lea.vmem [#allocation2], %s685_s14 }
  0x2b   : > { %s288_s3 = sshll.u32 %s280_s8, 4  ;;  %p1161_p5 = pnand %p752_p3, %p1138_p12  ;;  %s289_s3 = int_to_ptr.vmem [resolvable:$true] %s288_s3 }
  0x2c   : > { %s277_s15 = scalar_lea.sflag [#allocation3], %s276_s13  ;;  %s851_s12 = scalar_lea.vmem %s289_s3, 128 }
  0x2d   : > { %p840_p7 = pneg %p1161_p5  ;;  %p852_p2 = scmp.ne.s32.totalorder %s289_s3, %s851_s12 }
  0x2e   : > { %s1011_s21 = smov [#allocation2]  }
  0x2f   : > { %p854_p6 = pnand %p852_p2, %p840_p7  ;;  %s856_s28 = sshll.u32 %s1011_s21, 4  ;;  %s857_s28 = int_to_ptr.vmem [resolvable:$false] %s856_s28 }
  0x30   : > { %s858_s17 = scalar_lea.vmem %s857_s28, 256  ;;  %p859_p13 = scmp.lt.s32.totalorder %s289_s3, %s857_s28 }
  0x31   : > { %p855_p9 = pneg %p854_p6  ;;  %p860_p11 = scmp.lt.s32.totalorder %s858_s17, %s851_s12 }
  0x33   : > { %p861_p10 = por %p860_p11, %p859_p13 }
  0x35   : > { %p862_p1 = pnand %p861_p10, %p855_p9 }
  0x37   : > { %865 = shalt.err (!%p862_p1)
}
  0x38   : > { %740 = dma.hbm_to_vmem [thread:$0]  (!%p1161_p5), %s286_s20, 128, %s289_s3, %s277_s15  }
  0x39   : > { %297 = sbr.rel (%p1111_p8) target bundleno = 720 (0x2d0), region = 40  ;;  %s1172_s8 = sand.u32 (!%p1111_p8), 1, %s990_s25  }
  0x3a   : > { %s1175_s22 = sshll.u32 (!%p1111_p8), %s1172_s8, 3  ;;  %s300_s28 = scalar_lea.sflag (!%p1111_p8), [#allocation3], %s1172_s8 }
  0x3b   : > { %s303_s13 = scalar_lea.vmem (!%p1111_p8), [#allocation2], %s1175_s22 }
  0x3e   : > { %969 = dma.done.wait (%p1101_p4), %s300_s28, 128  }
  0x3f   : > { %971 = vsyncadd (%p1101_p4), %s300_s28, 4294967168  ;;  %p1341_p1 = scmp.eq.s32.totalorder %s1090_s30, 0 }
  0x41   : > { %973 = dma.done.wait (%p1341_p1), [#allocation6], 512   ;;  %p1342_p8 = pmov %p1341_p1 }
  0x42   : > { %vm351_vm0 = vcmask 261120   ;;  %v348_v0 = vld [vmem:[%s303_s13] sm:$0xff]  ;;  %v1012_v8 = vmov 0.0   ;;  %vm1013_vm1 = vmmov 0   ;;  %v381_v10 = vld [vmem:[#allocation5 + $0x8] sm:$0xff]  ;;  %v380_v11 = vld [vmem:[#allocation5] sm:$0xff] }
  0x43   : > { %975 = vsyncadd (%p1342_p8), [#allocation6], 4294966784  ;;  %v352_v1 = vsel %vm351_vm0, %v348_v0, 0.0  ;;  %v383_v7 = vld [vmem:[#allocation5 + $0x18] sm:$0xff]  ;;  %710 = vmatprep.subr.mxu0 %v1012_v8  ;;  %v382_v9 = vld [vmem:[#allocation5 + $0x10] sm:$0xff]  ;;  %718 = vmatprep.mubr.msk.f32.mxu0 %vm1013_vm1, %v1012_v8  ;;  %s1200_s18 = sshll.u32 %s998_s27, 7 }
  0x44   : > { %353 = vadd.xlane.f32.xlu0 %v352_v1  ;;  %711 = vmatpush3.msra.mxu0 %v383_v7  ;;  %v693_v16 = vld [vmem:[%s1316_s1] ss:$0 sm:$0xff]  ;;  %s333_s19 = scalar_lea.vmem [#allocation7], %s1175_s22  ;;  %s1207_s17 = scalar_lea.hbm %s1320_s5, %s1200_s18 }
  0x45   : > { %712 = vmatprep.subr.mxu0 %v1012_v8  ;;  %v694_v18 = vld [vmem:[%s1317_s2] ss:$0 sm:$0xff]  ;;  %s499_s20 = sshll.u32 %s333_s19, 4  ;;  %s1014_s28 = smov 96   ;;  %s1209_s20 = int_to_ptr.vmem [resolvable:$true] %s499_s20 }
  0x46   : > { %713 = vmatpush3.msra.mxu0 %v382_v9  ;;  %v695_v21 = vld [vmem:[%s1319_s4] ss:$0 sm:$0xff]  ;;  %s475_s27 = scalar_lea.sflag [#allocation4], %s1172_s8  ;;  %s866_s13 = scalar_lea.vmem %s1209_s20, 128 }
  0x47   : > { %714 = vmatprep.subr.mxu0 %v1012_v8  ;;  %p867_p4 = scmp.ne.s32.totalorder %s1209_s20, %s866_s13  ;;  %s1015_s3 = smov [#allocation7]  }
  0x48   : > { %715 = vmatpush3.msra.mxu0 %v381_v10  ;;  %s870_s9 = sshll.u32 %s1015_s3, 4  ;;  %s871_s9 = int_to_ptr.vmem [resolvable:$false] %s870_s9 }
  0x49   : > { %716 = vmatprep.subr.mxu0 %v1012_v8  ;;  %p868_p10 = pnand %p867_p4, %p1144_p0  ;;  %s872_s10 = scalar_lea.vmem %s871_s9, 256 }
  0x4a   : > { %717 = vmatpush3.msra.mxu0 %v380_v11  ;;  %p873_p3 = scmp.lt.s32.totalorder %s1209_s20, %s871_s9  ;;  %p874_p5 = scmp.lt.s32.totalorder %s872_s10, %s866_s13 }
  0x4b   : > { %p869_p12 = pneg %p868_p10 }
  0x4c   : > { %p875_p7 = por %p874_p5, %p873_p3 }
  0x4e   : > { %p876_p2 = pnand %p875_p7, %p869_p12 }
  0xcd   : > { %v354_v2 = vpop.xlane.xlu0 %353 }
  0xce   : > { %v356_v3 = vmul.f32 0.03125, %v354_v2 }
  0xd0   : > { %v357_v4 = vsub.f32 %v348_v0, %v356_v3 }
  0xd2   : > { %v358_v5 = vmul.f32 %v357_v4, %v357_v4 }
  0xd4   : > { %v359_v6 = vsel %vm351_vm0, %v358_v5, 0.0 }
  0xd5   : > { %360 = vadd.xlane.f32.xlu0 %v359_v6 }
 0x15e   : > { %v361_v12 = vpop.xlane.xlu0 %360 }
 0x15f   : > { %v362_v13 = vmul.f32 0.03125, %v361_v12 }
 0x161   : > { %v363_v14 = vadd.f32 1e-06, %v362_v13 }
 0x163   : > { %810 = vrsqrt.f32 %v363_v14 }
 0x170   : > { %v811_v15 = vpop.eup %810 }
 0x171   : > { %v365_v17 = vmul.f32 %v811_v15, %v357_v4 }
 0x173   : > { %v372_v19 = vmul.f32 %v693_v16, %v365_v17 }
 0x175   : > { %v379_v20 = vadd.f32 %v694_v18, %v372_v19 }
 0x177   : > { %719 = vmatmul.mubr.msk.f32.vlgmr.msra.gmra.mxu0 %vm351_vm0, %v379_v20 }
 0x237   : > { %v460_v22 = vpop.f32.mrf.mxu0 }
 0x238   : > { %v461_v23 = vadd.f32 %v695_v21, %v460_v22 }
 0x239   : > { %v720_v24 = vpop.f32.mrf.mxu0 }
 0x23a   : > { %466 = vrot.lane.b32.xlu1 %v461_v23, %s1014_s28  ;;  %464 = vst.msk [vmem:[%s333_s19] sm:$0xff] %vm351_vm0, %v461_v23 }
 0x23b   : > { %879 = shalt.err (!%p876_p2)
}
 0x23c   : > { %s880_s11 = scalar_lea.hbm %s1207_s17, 128  ;;  %s884_s14 = scalar_lea.hbm %s1320_s5, 256 }
 0x23d   : > { %p881_p6 = scmp.ne.s32.totalorder %s1207_s17, %s880_s11  ;;  %p885_p11 = scmp.lt.s32.totalorder %s1207_s17, %s1320_s5 }
 0x23e   : > { %p886_p1 = scmp.lt.s32.totalorder %s884_s14, %s880_s11 }
 0x23f   : > { %p882_p9 = pnand %p881_p6, %p1144_p0 }
 0x240   : > { %p887_p8 = por %p886_p1, %p885_p11 }
 0x241   : > { %p883_p13 = pneg %p882_p9 }
 0x243   : > { %p888_p4 = pnand %p887_p8, %p883_p13 }
 0x245   : > { %891 = shalt.err (!%p888_p4)
}
 0x246   : > { %727 = dma.vmem_to_hbm [thread:$0]  (%p1144_p0), %s1209_s20, 128, %s1207_s17, %s475_s27  }
 0x247   : > { %s1016_s21 = smov 64   ;;  %s479_s28 = sand.u32 1, %s1090_s30  }
 0x248   : > { %470 = vrot.lane.b32.xlu1 %v461_v23, %s1016_s21  ;;  %s340_s13 = scalar_lea.vmem [#allocation8], %s1175_s22  ;;  %s1239_s11 = scalar_lea.hbm %s1321_s6, %s1200_s18 }
 0x249   : > { %s513_s3 = sshll.u32 %s340_s13, 4  ;;  %s347_s8 = scalar_lea.vmem [#allocation10], %s1175_s22  ;;  %s1241_s3 = int_to_ptr.vmem [resolvable:$true] %s513_s3 }
 0x24a   : > { %s527_s15 = sshll.u32 %s347_s8, 4  ;;  %s1247_s20 = scalar_lea.sflag [#allocation9], %s479_s28  ;;  %s528_s15 = int_to_ptr.vmem [resolvable:$true] %s527_s15 }
 0x24b   : > { %s892_s30 = scalar_lea.vmem %s1241_s3, 128  ;;  %s1017_s17 = smov [#allocation8]  }
 0x24c   : > { %p893_p10 = scmp.ne.s32.totalorder %s1241_s3, %s892_s30  ;;  %s896_s27 = sshll.u32 %s1017_s17, 4  ;;  %s897_s27 = int_to_ptr.vmem [resolvable:$false] %s896_s27 }
 0x24d   : > { %s898_s14 = scalar_lea.vmem %s897_s27, 256  ;;  %p899_p5 = scmp.lt.s32.totalorder %s1241_s3, %s897_s27 }
 0x24e   : > { %p894_p12 = pnand %p893_p10, %p1144_p0  ;;  %p900_p7 = scmp.lt.s32.totalorder %s898_s14, %s892_s30 }
 0x250   : > { %p895_p3 = pneg %p894_p12  ;;  %p901_p2 = por %p900_p7, %p899_p5 }
 0x252   : > { %p902_p6 = pnand %p901_p2, %p895_p3 }
 0x2ac   : > { %v467_v25 = vpop.permute.xlu1 %466 }
 0x2ad   : > { %469 = vst.msk [vmem:[%s340_s13] sm:$0xff] %vm351_vm0, %v467_v25 }
 0x2ae   : > { %905 = shalt.err (!%p902_p6)
}
 0x2af   : > { %s906_s19 = scalar_lea.hbm %s1239_s11, 128  ;;  %s910_s28 = scalar_lea.hbm %s1321_s6, 256 }
 0x2b0   : > { %p907_p9 = scmp.ne.s32.totalorder %s1239_s11, %s906_s19  ;;  %p911_p1 = scmp.lt.s32.totalorder %s1239_s11, %s1321_s6 }
 0x2b1   : > { %p912_p8 = scmp.lt.s32.totalorder %s910_s28, %s906_s19 }
 0x2b2   : > { %p908_p13 = pnand %p907_p9, %p1144_p0 }
 0x2b3   : > { %p913_p4 = por %p912_p8, %p911_p1 }
 0x2b4   : > { %p909_p11 = pneg %p908_p13 }
 0x2b6   : > { %p914_p10 = pnand %p913_p4, %p909_p11 }
 0x2b8   : > { %917 = shalt.err (!%p914_p10)
}
 0x2b9   : > { %728 = dma.vmem_to_hbm [thread:$0]  (%p1144_p0), %s1241_s3, 128, %s1239_s11, %s1247_s20  }
 0x2ba   : > { %s525_s17 = scalar_lea.hbm %s1322_s7, %s1200_s18  ;;  %v471_v26 = vpop.permute.xlu1 %470  ;;  %s918_s27 = scalar_lea.vmem %s528_s15, 128 }
 0x2bb   : > { %473 = vst.msk [vmem:[%s347_s8] sm:$0xff] %vm351_vm0, %v471_v26  ;;  %p919_p12 = scmp.ne.s32.totalorder %s528_s15, %s918_s27  ;;  %s1018_s14 = smov [#allocation10]  }
 0x2bc   : > { %s922_s19 = sshll.u32 %s1018_s14, 4  ;;  %s923_s19 = int_to_ptr.vmem [resolvable:$false] %s922_s19 }
 0x2bd   : > { %p920_p3 = pnand %p919_p12, %p1144_p0  ;;  %s924_s12 = scalar_lea.vmem %s923_s19, 256 }
 0x2be   : > { %p925_p7 = scmp.lt.s32.totalorder %s528_s15, %s923_s19  ;;  %p926_p2 = scmp.lt.s32.totalorder %s924_s12, %s918_s27 }
 0x2bf   : > { %p921_p5 = pneg %p920_p3 }
 0x2c0   : > { %p927_p6 = por %p926_p2, %p925_p7 }
 0x2c2   : > { %p928_p9 = pnand %p927_p6, %p921_p5 }
 0x2c4   : > { %931 = shalt.err (!%p928_p9)
}
 0x2c5   : > { %s932_s18 = scalar_lea.hbm %s525_s17, 128  ;;  %s936_s11 = scalar_lea.hbm %s1322_s7, 256 }
 0x2c6   : > { %p933_p13 = scmp.ne.s32.totalorder %s525_s17, %s932_s18  ;;  %p937_p8 = scmp.lt.s32.totalorder %s525_s17, %s1322_s7 }
 0x2c7   : > { %p938_p4 = scmp.lt.s32.totalorder %s936_s11, %s932_s18 }
 0x2c8   : > { %p934_p11 = pnand %p933_p13, %p1144_p0 }
 0x2c9   : > { %p939_p10 = por %p938_p4, %p937_p8 }
 0x2ca   : > { %p935_p1 = pneg %p934_p11 }
 0x2cc   : > { %p940_p12 = pnand %p939_p10, %p935_p1 }
 0x2ce   : > { %943 = shalt.err (!%p940_p12)
}
 0x2cf   : > { %729 = dma.vmem_to_hbm [thread:$0]  (%p1144_p0), %s528_s15, 128, %s525_s17, %s1247_s20  }
 0x2d0 PF: > { %s1343_s28 = sld [smem:[#allocation16_spill]]  ;;  %s539_s13 = sand.u32 1, %s986_s24  }
 0x2d1   : > { %p1345_p5 = scmp.ge.s32.totalorder %s1006_s29, 2  ;;  %s540_s9 = scalar_lea.sflag [#allocation4], %s539_s13 }
 0x2d6   : > { %p1344_p3 = scmp.ne.s32.totalorder %s1343_s28, 0 }
 0x2d8   : > { %p742_p7 = pnand %p1345_p5, %p1344_p3 }
 0x2da   : > { %p743_p2 = pneg %p742_p7 }
 0x2dc   : > { %977 = dma.done.wait (%p743_p2), %s540_s9, 128  }
 0x2dd   : > { %979 = vsyncadd (%p743_p2), %s540_s9, 4294967168  ;;  %s1346_s10 = sadd.s32 4294967294, %s1006_s29  }
 0x2de   : > { %s548_s30 = sand.u32 1, %s1346_s10  }
 0x2df   : > { %s549_s27 = scalar_lea.sflag [#allocation9], %s548_s30 }
 0x2e0   : > { %981 = dma.done.wait (%p743_p2), %s549_s27, 256  }
 0x2e1   : > { %983 = vsyncadd (%p743_p2), %s549_s27, 4294967040  ;;  %s28_s29 = sadd.s32 1, %s1006_s29   ;;  %s1347_s27 = sld [smem:[#allocation15_spill]] }
 0x2e2   : > { %p25_p0 = scmp.ge.s32.totalorder %s28_s29, 4   ;;  %s1348_s28 = sld [smem:[#allocation17_spill]] }
 0x2e3   : > { %s1349_s24 = smov %s990_s25  ;;  %s1350_s25 = smov %s994_s26 }
 0x2e4   : > { %s1351_s26 = smov %s1153_s16  ;;  %27 = sbr.rel (!%p25_p0) target bundleno = 11 (0xb), region = 121 }
 0x2e9   :  { %563 = vsyncpa [#allocation3], 1 }
 0x2ea   :  { %565 = vsyncpa [#allocation3 + $0x1], 1 }
 0x2eb   :  { %566 = vsyncpa [#allocation6], 1 }
 0x2ec   :  { %567 = vsyncpa [#allocation4], 1 }
 0x2ed   :  { %569 = vsyncpa [#allocation4 + $0x1], 1 }
 0x2ee   :  { %570 = vsyncpa [#allocation9], 1 }
 0x2ef   :  { %572 = vsyncpa [#allocation9 + $0x1], 1 }

</bundles_post_ra>
